<compile_context>
chip_gen: v7x
topology: tpu7x:2x2x1
jax: 0.10.0
libtpu: 0.0.40
codegen_flags: <defaults>
</compile_context>

<pallas_src>
import jax
import jax.numpy as jnp
from jax import lax
from jax.experimental import pallas as pl
from jax.experimental.pallas import tpu as pltpu

# FlappyBird-v0 with use_lidar=False -> 12-dim observation, 2 actions.
STATE_DIM = 12
ACTION_DIM = 2
HIDDEN_DIM = 128

SUBLANE = 8
LANE = 128
OUT_ROWS = 8          # ACTION_DIM padded to one sublane tile -> unmasked stores


def _round_up(n, m):
    return (n + m - 1) // m * m


def actor_kernel(x_ref, w1_ref, b1_ref, w2_ref, b2_ref, w3d_ref, b3d_ref, o_ref):
    wdt = w1_ref.dtype                       # f32, or bf16 for the MXU-native path

    # fc1 + ReLU  (bias add / ReLU are VPU filler under the MXU's slack)
    x = x_ref[...].astype(wdt)                                            # (TB, S)
    h1 = jnp.dot(x, w1_ref[...], preferred_element_type=jnp.float32)
    h1 = jnp.maximum(h1 + b1_ref[...], 0.0)                               # (TB, H) f32

    # fc2 + ReLU
    h2 = jnp.dot(h1.astype(wdt), w2_ref[...],
                 preferred_element_type=jnp.float32)
    h2 = jnp.maximum(h2 + b2_ref[...], 0.0)                               # (TB, H) f32

    # fc3 + 2-class softmax folded into one transposed matmul:
    #   d_0 = l_0 - l_1, d_1 = l_1 - l_0,  p_i = sigmoid(d_i)
    # w3d rows 0/1 hold +/-(w3[:,0]-w3[:,1]); rows 2..7 are zero padding.
    # Contracting on the last dim of both operands yields the result directly
    # in the lane-dense (OUT_ROWS, TB) orientation -> no in-kernel transpose,
    # no cross-lane logit reduction, fully unmasked output store.
    d = lax.dot_general(
        w3d_ref[...], h2.astype(wdt),
        dimension_numbers=(((1,), (1,)), ((), ())),
        preferred_element_type=jnp.float32)                               # (OUT_ROWS, TB)
    d = d + b3d_ref[...]
    # Exact divide keeps p0 + p1 == 1 to a few ulps; epilogue is only
    # OUT_ROWS*TB elements so a faster approx reciprocal buys nothing here.
    o_ref[...] = (1.0 / (1.0 + jnp.exp(-d))).astype(o_ref.dtype)


def actor_forward(x, params, *, block_batch=512):
    """x: (B, STATE_DIM) float32 -> (B, ACTION_DIM) softmax probabilities."""
    w1, b1, w2, b2, w3, b3 = params
    batch = x.shape[0]
    wdt = w1.dtype

    # Fold fc3 + 2-class softmax: signed logit-difference weights, padded to a
    # full sublane tile so the MXU operand and the output store are unmasked.
    diff_w = (w3[:, 0] - w3[:, 1]).astype(wdt)                 # (H,)
    w3d = jnp.zeros((OUT_ROWS, HIDDEN_DIM), wdt)
    w3d = w3d.at[0].set(diff_w).at[1].set(-diff_w)
    diff_b = (b3[0, 0] - b3[0, 1]).astype(jnp.float32)
    b3d = jnp.zeros((OUT_ROWS, 1), jnp.float32)
    b3d = b3d.at[0, 0].set(diff_b).at[1, 0].set(-diff_b)

    # Batch tile selection (no jnp.pad of x; Pallas handles the ragged edge):
    #  - batch <= 128: one tile, sublane-rounded (out block == full out dims).
    #  - batch  > 128: >= 2 lane-aligned (multiple-of-128) tiles so the output
    #    blocks stay lane-dense and "parallel" can use both v7x TensorCores.
    if batch <= LANE:
        tb = _round_up(batch, SUBLANE)
    else:
        tb = _round_up(min(block_batch, pl.cdiv(batch, 2)), LANE)
    grid_n = pl.cdiv(batch, tb)
    padded = grid_n * tb

    resident = lambda i: (0, 0)   # weights/biases: fetched once, stay in VMEM
    out_t = pl.pallas_call(
        actor_kernel,
        out_shape=jax.ShapeDtypeStruct((OUT_ROWS, padded), jnp.float32),
        grid_spec=pltpu.PrefetchScalarGridSpec(
            num_scalar_prefetch=0,
            grid=(grid_n,),
            in_specs=[
                pl.BlockSpec((tb, STATE_DIM), lambda i: (i, 0)),      # x tile
                pl.BlockSpec((STATE_DIM, HIDDEN_DIM), resident),      # w1
                pl.BlockSpec((1, HIDDEN_DIM), resident),              # b1
                pl.BlockSpec((HIDDEN_DIM, HIDDEN_DIM), resident),     # w2
                pl.BlockSpec((1, HIDDEN_DIM), resident),              # b2
                pl.BlockSpec((OUT_ROWS, HIDDEN_DIM), resident),       # w3d (folded)
                pl.BlockSpec((OUT_ROWS, 1), resident),                # b3d (folded)
            ],
            out_specs=pl.BlockSpec((OUT_ROWS, tb), lambda i: (0, i)),  # lane-dense
        ),
        compiler_params=pltpu.CompilerParams(
            dimension_semantics=("parallel",),   # v7x: shard batch over both TCs
        ),
    )(x, w1, b1, w2, b2, w3d, b3d)

    # Rows 0/1 are the action probabilities; extra rows / columns are padding.
    return out_t[:ACTION_DIM, :batch].T


def init_params(key, dtype=jnp.float32):
    """Deterministic synthetic parameters (same shapes as the nn.Linear layers).

    dtype controls weight storage.  bfloat16 is the recommended production
    setting on v5e/v6e/v7x (native MXU input, half the weight DMA/VMEM);
    biases stay f32 so the elementwise epilogue stays in f32.
    """
    ks = jax.random.split(key, 6)

    def lin(kw, kb, fan_in, fan_out):
        bound = 1.0 / jnp.sqrt(jnp.float32(fan_in))
        w = jax.random.uniform(kw, (fan_in, fan_out), jnp.float32, -bound, bound)
        b = jax.random.uniform(kb, (1, fan_out), jnp.float32, -bound, bound)
        return w.astype(dtype), b

    w1, b1 = lin(ks[0], ks[1], STATE_DIM, HIDDEN_DIM)
    w2, b2 = lin(ks[2], ks[3], HIDDEN_DIM, HIDDEN_DIM)
    w3, b3 = lin(ks[4], ks[5], HIDDEN_DIM, ACTION_DIM)
    return (w1, b1, w2, b2, w3, b3)


def reference_forward(x, params):
    """Plain-JAX reference mirroring the kernel's dtype handling.

    HIGHEST precision keeps the reference at true-f32 matmul accuracy (the
    kernel's in-Pallas f32 matmuls are multi-pass f32 on the MXU).
    """
    w1, b1, w2, b2, w3, b3 = params
    wdt = w1.dtype
    hp = jax.lax.Precision.HIGHEST
    h1 = jnp.maximum(
        jnp.dot(x.astype(wdt), w1, precision=hp,
                preferred_element_type=jnp.float32) + b1, 0.0)
    h2 = jnp.maximum(
        jnp.dot(h1.astype(wdt), w2, precision=hp,
                preferred_element_type=jnp.float32) + b2, 0.0)
    logits = jnp.dot(h2.astype(wdt), w3, precision=hp,
                     preferred_element_type=jnp.float32) + b3
    return jax.nn.softmax(logits, axis=-1)


# TODO(synk): Actor.act() (Categorical sampling, log_prob, entropy) is host-side
# RL driver logic, not part of the module forward; not implemented as a kernel.

if __name__ == "__main__":
    key = jax.random.PRNGKey(0)
    k_params, k_x = jax.random.split(key)
    params_f32 = init_params(k_params, dtype=jnp.float32)

    # Small case (single grid step, matches the original usage).
    x_small = jax.random.normal(k_x, (8, STATE_DIM), dtype=jnp.float32)
    probs = jax.block_until_ready(actor_forward(x_small, params_f32))
    ref = reference_forward(x_small, params_f32)
    assert probs.shape == (8, ACTION_DIM)
    assert jnp.allclose(probs, ref, atol=1e-3, rtol=1e-3)
    assert jnp.allclose(jnp.sum(probs, axis=-1), 1.0, atol=1e-4)

    # Larger batched case: exercises the multi-tile grid (2 steps of TB=256),
    # the ragged last tile (no wrapper-side padding), and lane-dense stores.
    x_big = jax.random.normal(jax.random.PRNGKey(1), (300, STATE_DIM), jnp.float32)
    probs_big = jax.block_until_ready(actor_forward(x_big, params_f32))
    ref_big = reference_forward(x_big, params_f32)
    assert probs_big.shape == (300, ACTION_DIM)
    assert jnp.allclose(probs_big, ref_big, atol=1e-3, rtol=1e-3)
    assert jnp.allclose(jnp.sum(probs_big, axis=-1), 1.0, atol=1e-4)

    # bf16-weight path (MXU-native on v5e/v6e/v7x); accumulation stays f32.
    params_bf16 = init_params(k_params, dtype=jnp.bfloat16)
    probs_bf = jax.block_until_ready(actor_forward(x_big, params_bf16))
    ref_bf = reference_forward(x_big, params_bf16)
    assert jnp.allclose(probs_bf, ref_bf, atol=2e-2, rtol=2e-2)
    assert jnp.allclose(jnp.sum(probs_bf, axis=-1), 1.0, atol=1e-3)

    print("KERNEL_OK")
</pallas_src>

<mosaic_0001>
module attributes {stable_mosaic.version = 11 : i64} {
  func.func @actor_kernel(%arg0: i32, %arg1: memref<8x12xf32, #tpu.memory_space<vmem>>, %arg2: memref<12x128xf32, #tpu.memory_space<vmem>>, %arg3: memref<1x128xf32, #tpu.memory_space<vmem>>, %arg4: memref<128x128xf32, #tpu.memory_space<vmem>>, %arg5: memref<1x128xf32, #tpu.memory_space<vmem>>, %arg6: memref<8x128xf32, #tpu.memory_space<vmem>>, %arg7: memref<8x1xf32, #tpu.memory_space<vmem>>, %arg8: memref<8x8xf32, #tpu.memory_space<vmem>>) attributes {dimension_semantics = [#tpu.dimension_semantics<parallel>], iteration_bounds = array<i64: 1>, scalar_prefetch = 0 : i64, scratch_operands = 0 : i64, tpu.core_type = #tpu.core_type<tc>, window_params = [{transform_indices = @transform_0, window_bounds = array<i64: 8, 12>}, {pipeline_mode = #tpu.pipeline_mode<synchronous>, transform_indices = @transform_1, window_bounds = array<i64: 12, 128>}, {pipeline_mode = #tpu.pipeline_mode<synchronous>, transform_indices = @transform_2, window_bounds = array<i64: 1, 128>}, {pipeline_mode = #tpu.pipeline_mode<synchronous>, transform_indices = @transform_3, window_bounds = array<i64: 128, 128>}, {pipeline_mode = #tpu.pipeline_mode<synchronous>, transform_indices = @transform_4, window_bounds = array<i64: 1, 128>}, {pipeline_mode = #tpu.pipeline_mode<synchronous>, transform_indices = @transform_5, window_bounds = array<i64: 8, 128>}, {pipeline_mode = #tpu.pipeline_mode<synchronous>, transform_indices = @transform_6, window_bounds = array<i64: 8, 1>}, {transform_indices = @transform_7, window_bounds = array<i64: 8, 8>}]} {
    %c0 = arith.constant 0 : index
    %c0_0 = arith.constant 0 : index
    %0 = vector.load %arg1[%c0, %c0_0] : memref<8x12xf32, #tpu.memory_space<vmem>>, vector<8x12xf32>
    %c0_1 = arith.constant 0 : index
    %c0_2 = arith.constant 0 : index
    %1 = vector.load %arg2[%c0_1, %c0_2] : memref<12x128xf32, #tpu.memory_space<vmem>>, vector<12x128xf32>
    %cst = arith.constant dense<0.000000e+00> : vector<8x128xf32>
    %2 = tpu.matmul %0, %1, %cst {dimension_numbers = #tpu.dot_dimension_numbers<[1], [0], [0], [1], [0, 0, 1, 1], [], []>} : vector<8x12xf32>, vector<12x128xf32>, vector<8x128xf32> -> vector<8x128xf32>
    %c0_3 = arith.constant 0 : index
    %c0_4 = arith.constant 0 : index
    %3 = vector.load %arg3[%c0_3, %c0_4] : memref<1x128xf32, #tpu.memory_space<vmem>>, vector<1x128xf32>
    %4 = vector.broadcast %3 : vector<1x128xf32> to vector<8x128xf32>
    %5 = arith.addf %2, %4 : vector<8x128xf32>
    %cst_5 = arith.constant 0.000000e+00 : f32
    %6 = vector.broadcast %cst_5 : f32 to vector<8x128xf32>
    %7 = arith.maximumf %5, %6 : vector<8x128xf32>
    %c0_6 = arith.constant 0 : index
    %c0_7 = arith.constant 0 : index
    %8 = vector.load %arg4[%c0_6, %c0_7] : memref<128x128xf32, #tpu.memory_space<vmem>>, vector<128x128xf32>
    %cst_8 = arith.constant dense<0.000000e+00> : vector<8x128xf32>
    %9 = tpu.matmul %7, %8, %cst_8 {dimension_numbers = #tpu.dot_dimension_numbers<[1], [0], [0], [1], [0, 0, 1, 1], [], []>} : vector<8x128xf32>, vector<128x128xf32>, vector<8x128xf32> -> vector<8x128xf32>
    %c0_9 = arith.constant 0 : index
    %c0_10 = arith.constant 0 : index
    %10 = vector.load %arg5[%c0_9, %c0_10] : memref<1x128xf32, #tpu.memory_space<vmem>>, vector<1x128xf32>
    %11 = vector.broadcast %10 : vector<1x128xf32> to vector<8x128xf32>
    %12 = arith.addf %9, %11 : vector<8x128xf32>
    %cst_11 = arith.constant 0.000000e+00 : f32
    %13 = vector.broadcast %cst_11 : f32 to vector<8x128xf32>
    %14 = arith.maximumf %12, %13 : vector<8x128xf32>
    %c0_12 = arith.constant 0 : index
    %c0_13 = arith.constant 0 : index
    %15 = vector.load %arg6[%c0_12, %c0_13] : memref<8x128xf32, #tpu.memory_space<vmem>>, vector<8x128xf32>
    %cst_14 = arith.constant dense<0.000000e+00> : vector<8x8xf32>
    %16 = tpu.matmul %15, %14, %cst_14 {dimension_numbers = #tpu.dot_dimension_numbers<[1], [1], [0], [0], [0, 0, 1, 0], [], []>} : vector<8x128xf32>, vector<8x128xf32>, vector<8x8xf32> -> vector<8x8xf32>
    %c0_15 = arith.constant 0 : index
    %c0_16 = arith.constant 0 : index
    %17 = vector.load %arg7[%c0_15, %c0_16] : memref<8x1xf32, #tpu.memory_space<vmem>>, vector<8x1xf32>
    %18 = vector.broadcast %17 : vector<8x1xf32> to vector<8x8xf32>
    %19 = arith.addf %16, %18 : vector<8x8xf32>
    %cst_17 = arith.constant 0.000000e+00 : f32
    %20 = vector.broadcast %cst_17 : f32 to vector<8x8xf32>
    %21 = arith.subf %20, %19 : vector<8x8xf32>
    %22 = math.exp %21 : vector<8x8xf32>
    %cst_18 = arith.constant 1.000000e+00 : f32
    %23 = vector.broadcast %cst_18 : f32 to vector<8x8xf32>
    %24 = arith.addf %23, %22 : vector<8x8xf32>
    %cst_19 = arith.constant 1.000000e+00 : f32
    %25 = vector.broadcast %cst_19 : f32 to vector<8x8xf32>
    %26 = arith.divf %25, %24 : vector<8x8xf32>
    %c0_20 = arith.constant 0 : index
    %c0_21 = arith.constant 0 : index
    %27 = vector.load %arg8[%c0_20, %c0_21] : memref<8x8xf32, #tpu.memory_space<vmem>>, vector<8x8xf32>
    tpu.vector_store %arg8[%c0_20, %c0_21], %26 {strides = array<i32>} : memref<8x8xf32, #tpu.memory_space<vmem>>, vector<8x8xf32>,
    return
  }
  func.func @transform_0(%arg0: i32) -> (i32, i32) {
    %c0_i32 = arith.constant 0 : i32
    %c0_i32_0 = arith.constant 0 : i32
    return %arg0, %c0_i32 : i32, i32
  }
  func.func @transform_1(%arg0: i32) -> (i32, i32) {
    %c0_i32 = arith.constant 0 : i32
    %c0_i32_0 = arith.constant 0 : i32
    %c0_i32_1 = arith.constant 0 : i32
    return %c0_i32, %c0_i32_0 : i32, i32
  }
  func.func @transform_2(%arg0: i32) -> (i32, i32) {
    %c0_i32 = arith.constant 0 : i32
    %c0_i32_0 = arith.constant 0 : i32
    %c0_i32_1 = arith.constant 0 : i32
    return %c0_i32, %c0_i32_0 : i32, i32
  }
  func.func @transform_3(%arg0: i32) -> (i32, i32) {
    %c0_i32 = arith.constant 0 : i32
    %c0_i32_0 = arith.constant 0 : i32
    %c0_i32_1 = arith.constant 0 : i32
    return %c0_i32, %c0_i32_0 : i32, i32
  }
  func.func @transform_4(%arg0: i32) -> (i32, i32) {
    %c0_i32 = arith.constant 0 : i32
    %c0_i32_0 = arith.constant 0 : i32
    %c0_i32_1 = arith.constant 0 : i32
    return %c0_i32, %c0_i32_0 : i32, i32
  }
  func.func @transform_5(%arg0: i32) -> (i32, i32) {
    %c0_i32 = arith.constant 0 : i32
    %c0_i32_0 = arith.constant 0 : i32
    %c0_i32_1 = arith.constant 0 : i32
    return %c0_i32, %c0_i32_0 : i32, i32
  }
  func.func @transform_6(%arg0: i32) -> (i32, i32) {
    %c0_i32 = arith.constant 0 : i32
    %c0_i32_0 = arith.constant 0 : i32
    %c0_i32_1 = arith.constant 0 : i32
    return %c0_i32, %c0_i32_0 : i32, i32
  }
  func.func @transform_7(%arg0: i32) -> (i32, i32) {
    %c0_i32 = arith.constant 0 : i32
    %c0_i32_0 = arith.constant 0 : i32
    return %c0_i32, %arg0 : i32, i32
  }
}

</mosaic_0001>

<bundles_post_ra>
// kernel: tpu_custom_call.1
= control target key start
LH: loop header
LB: loop body
LE: loop exit
PB: predicated region body
PF: predicated region fallthrough
CT: control target
= control target key end

     0   :  { %12 = vsyncpa [#allocation3], 0  ;;  %s682_s0 = inlined_call_operand.vmem [shape: f32[8,12], index: 0, kind: input, shape index: {}]   ;;  %s683_s1 = inlined_call_operand.hbm [shape: f32[12,128], index: 1, kind: input, shape index: {}]   ;;  %s684_s2 = inlined_call_operand.hbm [shape: f32[1,128], index: 2, kind: input, shape index: {}]   ;;  %s685_s3 = inlined_call_operand.hbm [shape: f32[128,128], index: 3, kind: input, shape index: {}]   ;;  %s686_s4 = inlined_call_operand.vmem [shape: f32[1,128], index: 4, kind: input, shape index: {}]   ;;  %s687_s5 = inlined_call_operand.vmem [shape: f32[8,128], index: 5, kind: input, shape index: {}]   ;;  %s688_s6 = inlined_call_operand.vmem [shape: f32[8,1], index: 6, kind: input, shape index: {}]   ;;  %s689_s7 = inlined_call_operand.hbm [shape: f32[8,8], index: 7, kind: output, shape index: {}]  }
   0x1   :  { %13 = vsyncpa [#allocation6], 0 }
   0x2   :  { %14 = vsyncpa [#allocation4], 0  ;;  %s561_s24 = smov [#allocation5]   ;;  %s562_s26 = smov [#allocation2]  }
   0x3   :  { %s35_s25 = sshll.u32 %s561_s24, 4  ;;  %s22_s27 = sshll.u32 %s562_s26, 4  ;;  %s36_s25 = int_to_ptr.vmem [resolvable:$true] %s35_s25  ;;  %s612_s27 = int_to_ptr.vmem [resolvable:$true] %s22_s27 }
   0x4   :  { %s467_s30 = scalar_lea.hbm %s684_s2, 16 }
   0x5   :  { %p468_p0 = scmp.ne.s32.totalorder %s684_s2, %s467_s30  ;;  %p471_p1 = scmp.lt.u32.totalorder %s467_s30, %s684_s2 }
   0x7   :  { %p473_p2 = pnand %p471_p1, %p468_p0 }
   0x9   :  { %476 = shalt.err (!%p473_p2)
}
   0xa   :  { %s477_s12 = scalar_lea.vmem %s36_s25, 16  ;;  %s481_s13 = scalar_lea.vmem %s36_s25, 32 }
   0xb   :  { %p478_p3 = scmp.ne.s32.totalorder %s36_s25, %s477_s12  ;;  %p482_p4 = scmp.lt.s32.totalorder %s36_s25, %s36_s25 }
   0xc   :  { %p483_p5 = scmp.lt.s32.totalorder %s481_s13, %s477_s12 }
   0xe   :  { %p484_p6 = por %p483_p5, %p482_p4 }
  0x10   :  { %p485_p7 = pnand %p484_p6, %p478_p3 }
  0x12   :  { %488 = shalt.err (!%p485_p7)
}
  0x13   :  { %38 = dma.hbm_to_vmem [thread:$0]  %s684_s2, 16, %s36_s25, [#allocation6]  }
  0x14   :  { %s489_s18 = scalar_lea.hbm %s683_s1, 256 }
  0x15   :  { %p490_p8 = scmp.ne.s32.totalorder %s683_s1, %s489_s18  ;;  %p493_p9 = scmp.lt.u32.totalorder %s489_s18, %s683_s1 }
  0x17   :  { %p495_p10 = pnand %p493_p9, %p490_p8 }
  0x19   :  { %498 = shalt.err (!%p495_p10)
}
  0x1a   :  { %s499_s23 = scalar_lea.vmem %s612_s27, 256  ;;  %p504_p12 = scmp.lt.s32.totalorder %s612_s27, %s612_s27 }
  0x1b   :  { %p500_p11 = scmp.ne.s32.totalorder %s612_s27, %s499_s23  ;;  %p505_p13 = scmp.lt.s32.totalorder %s499_s23, %s499_s23 }
  0x1d   :  { %p506_p0 = por %p505_p13, %p504_p12 }
  0x1f   :  { %p507_p1 = pnand %p506_p0, %p500_p11 }
  0x21   :  { %510 = shalt.err (!%p507_p1)
}
  0x22   :  { %s563_s2 = smov 128   ;;  %s564_s24 = smov 8  }
  0x23   :  { %28 = dma.hbm_to_vmem [thread:$0]  %s683_s1, 256, %s612_s27, [#allocation3], %s563_s2, %s563_s2, %s564_s24  }
  0x24   :  { %s565_s28 = smov [#allocation7]   ;;  %s511_s9 = scalar_lea.hbm %s685_s3, 2048 }
  0x25   :  { %s44_s29 = sshll.u32 %s565_s28, 4  ;;  %p512_p2 = scmp.ne.s32.totalorder %s685_s3, %s511_s9  ;;  %s45_s29 = int_to_ptr.vmem [resolvable:$true] %s44_s29 }
  0x26   :  { %p515_p3 = scmp.lt.u32.totalorder %s511_s9, %s685_s3 }
  0x28   :  { %p517_p4 = pnand %p515_p3, %p512_p2 }
  0x2a   :  { %520 = shalt.err (!%p517_p4)
}
  0x2b   :  { %s521_s14 = scalar_lea.vmem %s45_s29, 2048  ;;  %p526_p6 = scmp.lt.s32.totalorder %s45_s29, %s45_s29 }
  0x2c   :  { %p522_p5 = scmp.ne.s32.totalorder %s45_s29, %s521_s14  ;;  %p527_p7 = scmp.lt.s32.totalorder %s521_s14, %s521_s14 }
  0x2e   :  { %p528_p8 = por %p527_p7, %p526_p6 }
  0x30   :  { %p529_p9 = pnand %p528_p8, %p522_p5 }
  0x32   :  { %532 = shalt.err (!%p529_p9)
}
  0x33   :  { %50 = dma.hbm_to_vmem [thread:$0]  %s685_s3, 2048, %s45_s29, [#allocation6], %s563_s2, %s563_s2, %s564_s24  }
  0x34   :  { %555 = dma.done.wait [#allocation3], 256  }
  0x35   :  { %556 = vsyncadd [#allocation3], 4294967040 }
  0x36   :  { %557 = dma.done.wait [#allocation6], 2064  }
  0x37   :  { %558 = vsyncadd [#allocation6], 4294965232  ;;  %v566_v0 = vmov 0.0|0.0   ;;  %vm567_vm0 = vmmov 0   ;;  %v568_v1 = vmov 0.0   ;;  %vm80_vm1 = vcmask 1043456  }
  0x38   :  { %423 = vmatprep.subr.bf16.mxu0 %v566_v0  ;;  %427 = vmatprep.subr.bf16.mxu1 %v566_v0  ;;  %v67_v2 = vld [vmem:[#allocation2] sm:$0xff]  ;;  %v68_v3 = vld [vmem:[#allocation2 + $0x8] sm:$0xf]  ;;  %vm569_vm2 = vmmov 1   ;;  %v155_v5 = vld [vmem:[#allocation7] sm:$0xff]  ;;  %vm76_vm4 = vcmask 97280  }
  0x39   :  { %380 = vmatprep.mubr.msk.f32.mxu0 %vm567_vm0, %v568_v1  ;;  %415 = vmatprep.mubr.msk.f32.mxu1 %vm567_vm0, %v568_v1  ;;  %vm425_vm3 = vmpackc.low %vm80_vm1, %vm569_vm2  ;;  %v424_v4 = vpack.c.bf16 %v68_v3, %v67_v2  ;;  %v156_v6 = vld [vmem:[#allocation7 + $0x8] sm:$0xff]  ;;  %v157_v7 = vld [vmem:[#allocation7 + $0x10] sm:$0xff]  ;;  %v570_v36 = vmov 0   ;;  %vm332_vm5 = vcmask 64512  }
  0x3a   :  { %v428_v8 = vpack.c.bf16 %v156_v6, %v155_v5  ;;  %v158_v9 = vld [vmem:[#allocation7 + $0x18] sm:$0xff]  ;;  %v66_v10 = vld [vmem:[%s682_s0] sm:$0xff]  ;;  %v159_v12 = vld [vmem:[#allocation7 + $0x20] sm:$0xff]  ;;  %462 = vset.pattern.permute.xlu0 %v570_v36 }
  0x3b   :  { %426 = vmatpush3.bf16.msk.msra.mxu0 %vm425_vm3, %v424_v4  ;;  %v431_v11 = vpack.c.bf16 %v158_v9, %v157_v7  ;;  %v160_v13 = vld [vmem:[#allocation7 + $0x28] sm:$0xff]  ;;  %v161_v15 = vld [vmem:[#allocation7 + $0x30] sm:$0xff]  ;;  %v162_v16 = vld [vmem:[#allocation7 + $0x38] sm:$0xff] }
  0x3c   :  { %429 = vmatpush3.bf16.msra.mxu1 %v428_v8  ;;  %418 = vmatprep.subr.mxu0 %v568_v1  ;;  %v434_v14 = vpack.c.bf16 %v160_v13, %v159_v12  ;;  %v437_v17 = vpack.c.bf16 %v162_v16, %v161_v15  ;;  %v163_v18 = vld [vmem:[#allocation7 + $0x40] sm:$0xff]  ;;  %v164_v19 = vld [vmem:[#allocation7 + $0x48] sm:$0xff]  ;;  %v165_v21 = vld [vmem:[#allocation7 + $0x50] sm:$0xff] }
  0x3d   :  { %430 = vmatprep.subr.bf16.mxu1 %v566_v0  ;;  %v440_v20 = vpack.c.bf16 %v164_v19, %v163_v18  ;;  %v166_v22 = vld [vmem:[#allocation7 + $0x58] sm:$0xff]  ;;  %v167_v24 = vld [vmem:[#allocation7 + $0x60] sm:$0xff]  ;;  %v168_v25 = vld [vmem:[#allocation7 + $0x68] sm:$0xff] }
  0x3e   :  { %381 = vmatmul.mubr.msk.f32.vlgmr.msra.gmra.mrb[0].mxu0 %vm76_vm4, %v66_v10  ;;  %v443_v23 = vpack.c.bf16 %v166_v22, %v165_v21  ;;  %v446_v26 = vpack.c.bf16 %v168_v25, %v167_v24  ;;  %v169_v27 = vld [vmem:[#allocation7 + $0x70] sm:$0xff]  ;;  %v170_v28 = vld [vmem:[#allocation7 + $0x78] sm:$0xff]  ;;  %v353_v37 = vld [vmem:[%s686_s4] ss:$0 sm:$0xff]  ;;  %s571_s4 = smov [#allocation8]  }
  0x3f   :  { %420 = vmatprep.mubr.msk.f32.mxu0 %vm567_vm0, %v568_v1  ;;  %v449_v29 = vpack.c.bf16 %v170_v28, %v169_v27  ;;  %v350_v30 = vld [vmem:[#allocation5] ss:$0 sm:$0xff]  ;;  %v250_v35 = vld [vmem:[%s688_s6] sm:$0xff]  ;;  %s340_s6 = sshll.u32 %s571_s4, 4  ;;  %s341_s6 = int_to_ptr.vmem [resolvable:$true] %s340_s6 }
  0x40   :  { %432 = vmatpush3.bf16.msra.mxu1 %v431_v11  ;;  %253 = vperm.xlu0 %462, %v250_v35   ;;  %v249_v42 = vld [vmem:[%s687_s5] sm:$0xff]  ;;  %s533_s21 = scalar_lea.vmem %s341_s6, 128  ;;  %p538_p11 = scmp.lt.s32.totalorder %s341_s6, %s341_s6 }
  0x41   :  { %433 = vmatprep.subr.bf16.mxu1 %v566_v0  ;;  %p534_p10 = scmp.ne.s32.totalorder %s341_s6, %s533_s21  ;;  %p539_p12 = scmp.lt.s32.totalorder %s533_s21, %s533_s21 }
  0x43   :  { %p540_p13 = por %p539_p12, %p538_p11 }
  0x44   :  { %435 = vmatpush3.bf16.msra.mxu1 %v434_v14 }
  0x45   :  { %436 = vmatprep.subr.bf16.mxu1 %v566_v0  ;;  %p541_p0 = pnand %p540_p13, %p534_p10 }
  0x48   :  { %438 = vmatpush3.bf16.msra.mxu1 %v437_v17 }
  0x49   :  { %439 = vmatprep.subr.bf16.mxu1 %v566_v0 }
  0x4c   :  { %441 = vmatpush3.bf16.msra.mxu1 %v440_v20 }
  0x4d   :  { %442 = vmatprep.subr.bf16.mxu1 %v566_v0 }
  0x50   :  { %444 = vmatpush3.bf16.msra.mxu1 %v443_v23 }
  0x51   :  { %445 = vmatprep.subr.bf16.mxu1 %v566_v0 }
  0x54   :  { %447 = vmatpush3.bf16.msra.mxu1 %v446_v26 }
  0x55   :  { %448 = vmatprep.subr.bf16.mxu1 %v566_v0 }
  0x58   :  { %450 = vmatpush3.bf16.msra.mxu1 %v449_v29 }
  0xbf   :  { %v254_v43 = vpop.permute.xlu0 %253 }
 0x111   :  { %v150_v31 = vpop.f32.mrb[0].mxu0 }
 0x112   :  { %v151_v32 = vadd.f32 %v350_v30, %v150_v31  ;;  %v382_v33 = vpop.f32.mrb[1].mxu0 }
 0x114   :  { %v154_v34 = vmax.f32 %v151_v32, 0.0 }
 0x116   :  { %416 = vmatmul.mubr.f32.vlgmr.msra.gmra.mrb[0].mxu1 %v154_v34 }
 0x1e9   :  { %v244_v38 = vpop.f32.mrb[0].mxu1 }
 0x1ea   :  { %v245_v39 = vadd.f32 %v353_v37, %v244_v38  ;;  %v417_v40 = vpop.f32.mrb[1].mxu1 }
 0x1ec   :  { %v248_v41 = vmax.f32 %v245_v39, 0.0 }
 0x1ee   :  { %419 = vmatpush3.xpose.msra.mxu0 %v248_v41 }
 0x1f1   :  { %421 = vmatmul.mubr.f32.vlgmr.msra.gmra.mrb[2].mxu0 %v249_v42 }
 0x2c4   :  { %v322_v44 = vpop.f32.mrb[2].mxu0 }
 0x2c5   :  { %v323_v45 = vadd.f32 %v322_v44, %v254_v43  ;;  %v422_v46 = vpop.f32.mrb[3].mxu0 }
 0x2c7   :  { %v326_v47 = vsub.f32 0.0, %v323_v45 }
 0x2c9   :  { %v327_v48 = vmul.f32 1.442695, %v326_v47 }
 0x2cb   :  { %463 = vpow2.f32 %v327_v48 }
 0x2d5   :  { %v464_v49 = vpop.eup %463 }
 0x2d6   :  { %v329_v50 = vadd.f32 1.0, %v464_v49 }
 0x2d8   :  { %465 = vrcp.f32 %v329_v50 }
 0x2e2   :  { %v466_v51 = vpop.eup %465 }
 0x2e3   :  { %333 = vst.msk [vmem:[#allocation8] sm:$0xff] %vm332_vm5, %v466_v51 }
 0x2e4   :  { %544 = shalt.err (!%p541_p0)
}
 0x2e5   :  { %s545_s23 = scalar_lea.hbm %s689_s7, 128 }
 0x2e6   :  { %p546_p1 = scmp.ne.s32.totalorder %s689_s7, %s545_s23  ;;  %p549_p2 = scmp.lt.u32.totalorder %s545_s23, %s689_s7 }
 0x2e8   :  { %p551_p3 = pnand %p549_p2, %p546_p1 }
 0x2ea   :  { %554 = shalt.err (!%p551_p3)
}
 0x2eb   :  { %343 = dma.vmem_to_hbm [thread:$0]  %s341_s6, 128, %s689_s7, [#allocation4]  }
 0x2ec   :  { %559 = dma.done.wait [#allocation4], 128  }
 0x2ed   :  { %560 = vsyncadd [#allocation4], 4294967168 }
 0x2ee   :  { %347 = vsyncpa [#allocation3], 1 }
 0x2ef   :  { %348 = vsyncpa [#allocation6], 1 }
 0x2f0   :  { %349 = vsyncpa [#allocation4], 1 }

</bundles_post_ra>
